<compile_context>
chip_gen: v7x
topology: tpu7x:2x2x1
jax: 0.10.0
libtpu: 0.0.40
codegen_flags: <defaults>
</compile_context>

<pallas_src>
import jax
import jax.numpy as jnp
from jax import lax
from jax.experimental import pallas as pl
from jax.experimental.pallas import tpu as pltpu


def _vmem_capacity_bytes():
    try:
        return int(pltpu.get_tpu_info().vmem_capacity_bytes)
    except Exception:
        pass
    try:
        kind = jax.devices()[0].device_kind.lower()
    except Exception:
        kind = ""
    if "v7" in kind:
        return 64 * 1024 * 1024
    if "v4" in kind or "v5" in kind or "v6" in kind:
        return 128 * 1024 * 1024
    return 64 * 1024 * 1024  # conservative default if detection fails


def downsample_block(x, weight, bias, *, compute_dtype=jnp.bfloat16,
                     out_dtype=None, vmem_limit_bytes=None):
    """Forward of DownSampleBlock: pad=(0,1,0,1) then 3x3 conv, stride 2."""
    N, C, H, W = x.shape
    Cout, Cin, KH, KW = weight.shape
    assert Cin == C and KH == 3 and KW == 3 and H >= 2 and W >= 2
    out_dtype = x.dtype if out_dtype is None else out_dtype

    OH, OW = H // 2, W // 2     # == floor((H+1-3)/2)+1 of the padded input
    WOg = OW + 1                # halo column folded into the flat row stride

    # ---------------- generation-aware VMEM budget -------------------------
    if vmem_limit_bytes is None:
        cap = _vmem_capacity_bytes()
        vmem_limit_bytes = max(32 << 20, min(112 << 20, cap - (16 << 20)))
    budget = int(0.7 * vmem_limit_bytes)          # headroom for compiler temps
    isz = jnp.dtype(compute_dtype).itemsize
    osz = jnp.dtype(out_dtype).itemsize

    # ---------------- Cin split (K-split) ----------------------------------
    # Keep the 9 double-buffered (Cout, tc) weight slabs to <= ~1/3 of budget.
    tc = C
    if C % 128 == 0:
        while tc % 256 == 0 and 2 * 9 * Cout * tc * isz > budget // 3:
            tc //= 2
    n_kb = C // tc

    # ---------------- output-row tile auto-sizing --------------------------
    # per grid step: xs block (tc, 4*Lt) x2, out block (Cout, TM) x2,
    # f32 acc (Cout, TM) x1, weights (9, Cout, tc) x2, bias (tiny).
    fixed = 2 * 9 * Cout * tc * isz + 2 * tc * 4 * WOg * isz + 4096
    per_row = 2 * tc * 4 * WOg * isz + (2 * osz + 4) * Cout * WOg
    toh = max(1, (budget - fixed) // per_row) if budget > fixed else 1
    toh = int(min(toh, OH, max(1, 8192 // WOg)))   # cap TM around 8192 lanes
    n_rb = -(-OH // toh)
    toh = -(-OH // n_rb)                           # re-balance row blocks
    if N * n_rb < 2 and OH >= 2:                   # >=2 blocks: v7x megacore
        n_rb, toh = 2, -(-OH // 2)
    OHp = n_rb * toh
    Lt = (toh + 1) * WOg                           # per-quadrant flat length
    TM = toh * WOg                                 # pixel tile (incl. junk col)

    # ---------------- wrapper restructure: pad + 2x2 space-to-depth --------
    # One ~1.05x-activation bf16 copy replaces the old 2.25x im2col tensor.
    Hp2, Wp2 = 2 * (OHp + 1), 2 * WOg
    xp = jnp.pad(x, ((0, 0), (0, 0), (0, Hp2 - H), (0, Wp2 - W)))
    xp = xp.astype(compute_dtype)
    xq = xp.reshape(N, C, OHp + 1, 2, WOg, 2)
    xq = jnp.transpose(xq, (0, 3, 5, 1, 2, 4))     # (N, ph, pw, C, OHp+1, WOg)
    rows = [lax.slice_in_dim(xq, b * toh, b * toh + toh + 1, axis=4)
            for b in range(n_rb)]                  # +1 halo row per row block
    xs = jnp.stack(rows, axis=1)                   # (N, rb, 2, 2, C, toh+1, WOg)
    xs = jnp.transpose(xs, (0, 1, 4, 2, 3, 5, 6)).reshape(N, n_rb, C, 4 * Lt)

    # Weights (Cout, Cin, 3, 3) -> (9, Cout, Cin); bias -> (Cout, 1) f32.
    w9 = jnp.transpose(weight, (2, 3, 0, 1)).reshape(9, Cout, C)
    w9 = w9.astype(compute_dtype)
    b2 = bias.reshape(Cout, 1).astype(jnp.float32)

    # ---------------- kernel ------------------------------------------------
    def kernel(w_ref, b_ref, xs_ref, o_ref, acc_ref):
        # w_ref : (9, Cout, tc) bf16 ; b_ref : (Cout, 1) f32
        # xs_ref: (tc, 4*Lt)   bf16 ; o_ref : (Cout, TM) ; acc_ref f32 scratch
        @pl.when(pl.program_id(2) == 0)
        def _():
            acc_ref[...] = jnp.zeros_like(acc_ref)

        acc = acc_ref[...]
        for kh in range(3):
            for kw in range(3):
                q = (kh % 2) * 2 + (kw % 2)            # parity quadrant
                s = (kh // 2) * WOg + (kw // 2)        # flat halo shift
                tap = xs_ref[:, pl.ds(q * Lt + s, TM)]  # (tc, TM) bf16
                acc = acc + jnp.dot(w_ref[3 * kh + kw], tap,
                                    preferred_element_type=jnp.float32)
        acc_ref[...] = acc

        @pl.when(pl.program_id(2) == pl.num_programs(2) - 1)
        def _():
            o_ref[...] = (acc_ref[...] + b_ref[...]).astype(o_ref.dtype)

    out_g = pl.pallas_call(
        kernel,
        out_shape=jax.ShapeDtypeStruct((N, n_rb, Cout, TM), out_dtype),
        grid=(N, n_rb, n_kb),
        in_specs=[
            pl.BlockSpec((9, Cout, tc), lambda n, b, k: (0, 0, k)),
            pl.BlockSpec((Cout, 1), lambda n, b, k: (0, 0)),
            pl.BlockSpec((None, None, tc, 4 * Lt), lambda n, b, k: (n, b, k, 0)),
        ],
        out_specs=pl.BlockSpec((None, None, Cout, TM),
                               lambda n, b, k: (n, b, 0, 0)),
        scratch_shapes=[pltpu.VMEM((Cout, TM), jnp.float32)],
        compiler_params=pltpu.CompilerParams(
            dimension_semantics=("parallel", "parallel", "arbitrary"),
            vmem_limit_bytes=int(vmem_limit_bytes),
        ),
        cost_estimate=pl.CostEstimate(
            flops=2 * 9 * Cout * C * N * n_rb * TM,
            transcendentals=0,
            bytes_accessed=int(xs.size) * isz + int(w9.size) * isz
                           + Cout * 4 + N * n_rb * Cout * TM * osz,
        ),
    )(w9, b2, xs)

    # (N, n_rb, Cout, TM) -> NCHW; only the junk halo column / padded rows
    # are stripped (no full output permute).
    out = out_g.reshape(N, n_rb, Cout, toh, WOg)
    out = jnp.transpose(out, (0, 2, 1, 3, 4)).reshape(N, Cout, OHp, WOg)
    return out[:, :, :OH, :OW]


if __name__ == "__main__":
    key = jax.random.PRNGKey(0)
    kx, kw_, kb = jax.random.split(key, 3)

    N, C, H, W = 2, 4, 16, 16
    x = jax.random.normal(kx, (N, C, H, W), dtype=jnp.float32)

    # Same parameter shapes as nn.Conv2d(C, C, 3, 2, 0).
    fan_in = C * 3 * 3
    bound = 1.0 / (fan_in ** 0.5)
    weight = jax.random.uniform(kw_, (C, C, 3, 3), jnp.float32, -bound, bound)
    bias = jax.random.uniform(kb, (C,), jnp.float32, -bound, bound)

    fwd = jax.jit(downsample_block)
    out = jax.block_until_ready(fwd(x, weight, bias))

    OH, OW = H // 2, W // 2
    assert out.shape == (N, C, OH, OW), out.shape

    # Reference: lax conv with asymmetric (0,1) padding on H and W (f32).
    ref = lax.conv_general_dilated(
        x, weight, window_strides=(2, 2), padding=((0, 1), (0, 1)),
        dimension_numbers=("NCHW", "OIHW", "NCHW")) + bias.reshape(1, C, 1, 1)

    # bf16 inputs with f32 MXU accumulation vs. the pure-f32 reference.
    err = float(jnp.max(jnp.abs(out - ref)))
    assert jnp.allclose(out, ref, atol=3e-2, rtol=3e-2), f"max abs err {err}"
    print("KERNEL_OK")
</pallas_src>

<mosaic_0001>
module attributes {stable_mosaic.version = 11 : i64} {
  func.func @kernel(%arg0: i32, %arg1: i32, %arg2: i32, %arg3: memref<9x4x4xbf16, #tpu.memory_space<vmem>>, %arg4: memref<4x1xf32, #tpu.memory_space<vmem>>, %arg5: memref<1x1x4x324xbf16, #tpu.memory_space<vmem>>, %arg6: memref<1x1x4x72xf32, #tpu.memory_space<vmem>>, %arg7: memref<4x72xf32, #tpu.memory_space<vmem>>) attributes {dimension_semantics = [#tpu.dimension_semantics<parallel>, #tpu.dimension_semantics<parallel>, #tpu.dimension_semantics<arbitrary>], iteration_bounds = array<i64: 2, 1, 1>, scalar_prefetch = 0 : i64, scratch_operands = 1 : i64, tpu.core_type = #tpu.core_type<tc>, window_params = [{transform_indices = @transform_0, window_bounds = array<i64: 9, 4, 4>}, {pipeline_mode = #tpu.pipeline_mode<synchronous>, transform_indices = @transform_1, window_bounds = array<i64: 4, 1>}, {transform_indices = @transform_2, window_bounds = array<i64: 1, 1, 4, 324>}, {transform_indices = @transform_3, window_bounds = array<i64: 1, 1, 4, 72>}]} {
    %c0_i32 = arith.constant 0 : i32
    %0 = arith.cmpi eq, %arg2, %c0_i32 : i32
    %1 = arith.extui %0 : i1 to i32
    %c0_i32_0 = arith.constant 0 : i32
    %2 = arith.cmpi ne, %1, %c0_i32_0 : i32
    scf.if %2 {
      %cst_62 = arith.constant 0.000000e+00 : f32
      %62 = vector.broadcast %cst_62 : f32 to vector<4x72xf32>
      %c0_63 = arith.constant 0 : index
      %c0_64 = arith.constant 0 : index
      %63 = vector.load %arg7[%c0_63, %c0_64] : memref<4x72xf32, #tpu.memory_space<vmem>>, vector<4x72xf32>
      tpu.vector_store %arg7[%c0_63, %c0_64], %62 {strides = array<i32>} : memref<4x72xf32, #tpu.memory_space<vmem>>, vector<4x72xf32>,
    } else {
    }
    %c0 = arith.constant 0 : index
    %c0_1 = arith.constant 0 : index
    %3 = vector.load %arg7[%c0, %c0_1] : memref<4x72xf32, #tpu.memory_space<vmem>>, vector<4x72xf32>
    %c0_2 = arith.constant 0 : index
    %c0_3 = arith.constant 0 : index
    %c0_4 = arith.constant 0 : index
    %c0_5 = arith.constant 0 : index
    %4 = vector.load %arg5[%c0_2, %c0_3, %c0_4, %c0_5] : memref<1x1x4x324xbf16, #tpu.memory_space<vmem>>, vector<1x1x4x72xbf16>
    %5 = vector.shape_cast %4 : vector<1x1x4x72xbf16> to vector<4x72xbf16>
    %c0_6 = arith.constant 0 : index
    %c0_7 = arith.constant 0 : index
    %c0_8 = arith.constant 0 : index
    %6 = vector.load %arg3[%c0_6, %c0_7, %c0_8] : memref<9x4x4xbf16, #tpu.memory_space<vmem>>, vector<1x4x4xbf16>
    %7 = vector.shape_cast %6 : vector<1x4x4xbf16> to vector<4x4xbf16>
    %cst = arith.constant dense<0.000000e+00> : vector<4x72xf32>
    %8 = tpu.matmul %7, %5, %cst {dimension_numbers = #tpu.dot_dimension_numbers<[1], [0], [0], [1], [0, 0, 1, 1], [], []>} : vector<4x4xbf16>, vector<4x72xbf16>, vector<4x72xf32> -> vector<4x72xf32>
    %9 = arith.addf %3, %8 : vector<4x72xf32>
    %c0_9 = arith.constant 0 : index
    %c0_10 = arith.constant 0 : index
    %c0_11 = arith.constant 0 : index
    %c81 = arith.constant 81 : index
    %10 = vector.load %arg5[%c0_9, %c0_10, %c0_11, %c81] : memref<1x1x4x324xbf16, #tpu.memory_space<vmem>>, vector<1x1x4x72xbf16>
    %11 = vector.shape_cast %10 : vector<1x1x4x72xbf16> to vector<4x72xbf16>
    %c1 = arith.constant 1 : index
    %c0_12 = arith.constant 0 : index
    %c0_13 = arith.constant 0 : index
    %12 = vector.load %arg3[%c1, %c0_12, %c0_13] : memref<9x4x4xbf16, #tpu.memory_space<vmem>>, vector<1x4x4xbf16>
    %13 = vector.shape_cast %12 : vector<1x4x4xbf16> to vector<4x4xbf16>
    %cst_14 = arith.constant dense<0.000000e+00> : vector<4x72xf32>
    %14 = tpu.matmul %13, %11, %cst_14 {dimension_numbers = #tpu.dot_dimension_numbers<[1], [0], [0], [1], [0, 0, 1, 1], [], []>} : vector<4x4xbf16>, vector<4x72xbf16>, vector<4x72xf32> -> vector<4x72xf32>
    %15 = arith.addf %9, %14 : vector<4x72xf32>
    %c0_15 = arith.constant 0 : index
    %c0_16 = arith.constant 0 : index
    %c0_17 = arith.constant 0 : index
    %c1_18 = arith.constant 1 : index
    %16 = vector.load %arg5[%c0_15, %c0_16, %c0_17, %c1_18] : memref<1x1x4x324xbf16, #tpu.memory_space<vmem>>, vector<1x1x4x72xbf16>
    %17 = vector.shape_cast %16 : vector<1x1x4x72xbf16> to vector<4x72xbf16>
    %c2 = arith.constant 2 : index
    %c0_19 = arith.constant 0 : index
    %c0_20 = arith.constant 0 : index
    %18 = vector.load %arg3[%c2, %c0_19, %c0_20] : memref<9x4x4xbf16, #tpu.memory_space<vmem>>, vector<1x4x4xbf16>
    %19 = vector.shape_cast %18 : vector<1x4x4xbf16> to vector<4x4xbf16>
    %cst_21 = arith.constant dense<0.000000e+00> : vector<4x72xf32>
    %20 = tpu.matmul %19, %17, %cst_21 {dimension_numbers = #tpu.dot_dimension_numbers<[1], [0], [0], [1], [0, 0, 1, 1], [], []>} : vector<4x4xbf16>, vector<4x72xbf16>, vector<4x72xf32> -> vector<4x72xf32>
    %21 = arith.addf %15, %20 : vector<4x72xf32>
    %c0_22 = arith.constant 0 : index
    %c0_23 = arith.constant 0 : index
    %c0_24 = arith.constant 0 : index
    %c162 = arith.constant 162 : index
    %22 = vector.load %arg5[%c0_22, %c0_23, %c0_24, %c162] : memref<1x1x4x324xbf16, #tpu.memory_space<vmem>>, vector<1x1x4x72xbf16>
    %23 = vector.shape_cast %22 : vector<1x1x4x72xbf16> to vector<4x72xbf16>
    %c3 = arith.constant 3 : index
    %c0_25 = arith.constant 0 : index
    %c0_26 = arith.constant 0 : index
    %24 = vector.load %arg3[%c3, %c0_25, %c0_26] : memref<9x4x4xbf16, #tpu.memory_space<vmem>>, vector<1x4x4xbf16>
    %25 = vector.shape_cast %24 : vector<1x4x4xbf16> to vector<4x4xbf16>
    %cst_27 = arith.constant dense<0.000000e+00> : vector<4x72xf32>
    %26 = tpu.matmul %25, %23, %cst_27 {dimension_numbers = #tpu.dot_dimension_numbers<[1], [0], [0], [1], [0, 0, 1, 1], [], []>} : vector<4x4xbf16>, vector<4x72xbf16>, vector<4x72xf32> -> vector<4x72xf32>
    %27 = arith.addf %21, %26 : vector<4x72xf32>
    %c0_28 = arith.constant 0 : index
    %c0_29 = arith.constant 0 : index
    %c0_30 = arith.constant 0 : index
    %c243 = arith.constant 243 : index
    %28 = vector.load %arg5[%c0_28, %c0_29, %c0_30, %c243] : memref<1x1x4x324xbf16, #tpu.memory_space<vmem>>, vector<1x1x4x72xbf16>
    %29 = vector.shape_cast %28 : vector<1x1x4x72xbf16> to vector<4x72xbf16>
    %c4 = arith.constant 4 : index
    %c0_31 = arith.constant 0 : index
    %c0_32 = arith.constant 0 : index
    %30 = vector.load %arg3[%c4, %c0_31, %c0_32] : memref<9x4x4xbf16, #tpu.memory_space<vmem>>, vector<1x4x4xbf16>
    %31 = vector.shape_cast %30 : vector<1x4x4xbf16> to vector<4x4xbf16>
    %cst_33 = arith.constant dense<0.000000e+00> : vector<4x72xf32>
    %32 = tpu.matmul %31, %29, %cst_33 {dimension_numbers = #tpu.dot_dimension_numbers<[1], [0], [0], [1], [0, 0, 1, 1], [], []>} : vector<4x4xbf16>, vector<4x72xbf16>, vector<4x72xf32> -> vector<4x72xf32>
    %33 = arith.addf %27, %32 : vector<4x72xf32>
    %c0_34 = arith.constant 0 : index
    %c0_35 = arith.constant 0 : index
    %c0_36 = arith.constant 0 : index
    %c163 = arith.constant 163 : index
    %34 = vector.load %arg5[%c0_34, %c0_35, %c0_36, %c163] : memref<1x1x4x324xbf16, #tpu.memory_space<vmem>>, vector<1x1x4x72xbf16>
    %35 = vector.shape_cast %34 : vector<1x1x4x72xbf16> to vector<4x72xbf16>
    %c5 = arith.constant 5 : index
    %c0_37 = arith.constant 0 : index
    %c0_38 = arith.constant 0 : index
    %36 = vector.load %arg3[%c5, %c0_37, %c0_38] : memref<9x4x4xbf16, #tpu.memory_space<vmem>>, vector<1x4x4xbf16>
    %37 = vector.shape_cast %36 : vector<1x4x4xbf16> to vector<4x4xbf16>
    %cst_39 = arith.constant dense<0.000000e+00> : vector<4x72xf32>
    %38 = tpu.matmul %37, %35, %cst_39 {dimension_numbers = #tpu.dot_dimension_numbers<[1], [0], [0], [1], [0, 0, 1, 1], [], []>} : vector<4x4xbf16>, vector<4x72xbf16>, vector<4x72xf32> -> vector<4x72xf32>
    %39 = arith.addf %33, %38 : vector<4x72xf32>
    %c0_40 = arith.constant 0 : index
    %c0_41 = arith.constant 0 : index
    %c0_42 = arith.constant 0 : index
    %c9 = arith.constant 9 : index
    %40 = vector.load %arg5[%c0_40, %c0_41, %c0_42, %c9] : memref<1x1x4x324xbf16, #tpu.memory_space<vmem>>, vector<1x1x4x72xbf16>
    %41 = vector.shape_cast %40 : vector<1x1x4x72xbf16> to vector<4x72xbf16>
    %c6 = arith.constant 6 : index
    %c0_43 = arith.constant 0 : index
    %c0_44 = arith.constant 0 : index
    %42 = vector.load %arg3[%c6, %c0_43, %c0_44] : memref<9x4x4xbf16, #tpu.memory_space<vmem>>, vector<1x4x4xbf16>
    %43 = vector.shape_cast %42 : vector<1x4x4xbf16> to vector<4x4xbf16>
    %cst_45 = arith.constant dense<0.000000e+00> : vector<4x72xf32>
    %44 = tpu.matmul %43, %41, %cst_45 {dimension_numbers = #tpu.dot_dimension_numbers<[1], [0], [0], [1], [0, 0, 1, 1], [], []>} : vector<4x4xbf16>, vector<4x72xbf16>, vector<4x72xf32> -> vector<4x72xf32>
    %45 = arith.addf %39, %44 : vector<4x72xf32>
    %c0_46 = arith.constant 0 : index
    %c0_47 = arith.constant 0 : index
    %c0_48 = arith.constant 0 : index
    %c90 = arith.constant 90 : index
    %46 = vector.load %arg5[%c0_46, %c0_47, %c0_48, %c90] : memref<1x1x4x324xbf16, #tpu.memory_space<vmem>>, vector<1x1x4x72xbf16>
    %47 = vector.shape_cast %46 : vector<1x1x4x72xbf16> to vector<4x72xbf16>
    %c7 = arith.constant 7 : index
    %c0_49 = arith.constant 0 : index
    %c0_50 = arith.constant 0 : index
    %48 = vector.load %arg3[%c7, %c0_49, %c0_50] : memref<9x4x4xbf16, #tpu.memory_space<vmem>>, vector<1x4x4xbf16>
    %49 = vector.shape_cast %48 : vector<1x4x4xbf16> to vector<4x4xbf16>
    %cst_51 = arith.constant dense<0.000000e+00> : vector<4x72xf32>
    %50 = tpu.matmul %49, %47, %cst_51 {dimension_numbers = #tpu.dot_dimension_numbers<[1], [0], [0], [1], [0, 0, 1, 1], [], []>} : vector<4x4xbf16>, vector<4x72xbf16>, vector<4x72xf32> -> vector<4x72xf32>
    %51 = arith.addf %45, %50 : vector<4x72xf32>
    %c0_52 = arith.constant 0 : index
    %c0_53 = arith.constant 0 : index
    %c0_54 = arith.constant 0 : index
    %c10 = arith.constant 10 : index
    %52 = vector.load %arg5[%c0_52, %c0_53, %c0_54, %c10] : memref<1x1x4x324xbf16, #tpu.memory_space<vmem>>, vector<1x1x4x72xbf16>
    %53 = vector.shape_cast %52 : vector<1x1x4x72xbf16> to vector<4x72xbf16>
    %c8 = arith.constant 8 : index
    %c0_55 = arith.constant 0 : index
    %c0_56 = arith.constant 0 : index
    %54 = vector.load %arg3[%c8, %c0_55, %c0_56] : memref<9x4x4xbf16, #tpu.memory_space<vmem>>, vector<1x4x4xbf16>
    %55 = vector.shape_cast %54 : vector<1x4x4xbf16> to vector<4x4xbf16>
    %cst_57 = arith.constant dense<0.000000e+00> : vector<4x72xf32>
    %56 = tpu.matmul %55, %53, %cst_57 {dimension_numbers = #tpu.dot_dimension_numbers<[1], [0], [0], [1], [0, 0, 1, 1], [], []>} : vector<4x4xbf16>, vector<4x72xbf16>, vector<4x72xf32> -> vector<4x72xf32>
    %57 = arith.addf %51, %56 : vector<4x72xf32>
    %c0_58 = arith.constant 0 : index
    %c0_59 = arith.constant 0 : index
    %58 = vector.load %arg7[%c0_58, %c0_59] : memref<4x72xf32, #tpu.memory_space<vmem>>, vector<4x72xf32>
    tpu.vector_store %arg7[%c0_58, %c0_59], %57 {strides = array<i32>} : memref<4x72xf32, #tpu.memory_space<vmem>>, vector<4x72xf32>,
    %c0_i32_60 = arith.constant 0 : i32
    %59 = arith.cmpi eq, %arg2, %c0_i32_60 : i32
    %60 = arith.extui %59 : i1 to i32
    %c0_i32_61 = arith.constant 0 : i32
    %61 = arith.cmpi ne, %60, %c0_i32_61 : i32
    scf.if %61 {
      %c0_62 = arith.constant 0 : index
      %c0_63 = arith.constant 0 : index
      %62 = vector.load %arg7[%c0_62, %c0_63] : memref<4x72xf32, #tpu.memory_space<vmem>>, vector<4x72xf32>
      %c0_64 = arith.constant 0 : index
      %c0_65 = arith.constant 0 : index
      %63 = vector.load %arg4[%c0_64, %c0_65] : memref<4x1xf32, #tpu.memory_space<vmem>>, vector<4x1xf32>
      %64 = vector.broadcast %63 : vector<4x1xf32> to vector<4x72xf32>
      %65 = arith.addf %62, %64 : vector<4x72xf32>
      %c0_66 = arith.constant 0 : index
      %c0_67 = arith.constant 0 : index
      %c0_68 = arith.constant 0 : index
      %c0_69 = arith.constant 0 : index
      %66 = vector.load %arg6[%c0_66, %c0_67, %c0_68, %c0_69] : memref<1x1x4x72xf32, #tpu.memory_space<vmem>>, vector<1x1x4x72xf32>
      %67 = vector.shape_cast %66 : vector<1x1x4x72xf32> to vector<4x72xf32>
      %68 = vector.shape_cast %65 : vector<4x72xf32> to vector<1x1x4x72xf32>
      tpu.vector_store %arg6[%c0_66, %c0_67, %c0_68, %c0_69], %68 {strides = array<i32>} : memref<1x1x4x72xf32, #tpu.memory_space<vmem>>, vector<1x1x4x72xf32>,
    } else {
    }
    return
  }
  func.func @transform_0(%arg0: i32, %arg1: i32, %arg2: i32) -> (i32, i32, i32) {
    %c0_i32 = arith.constant 0 : i32
    %c0_i32_0 = arith.constant 0 : i32
    %c0_i32_1 = arith.constant 0 : i32
    return %c0_i32, %c0_i32_0, %arg2 : i32, i32, i32
  }
  func.func @transform_1(%arg0: i32, %arg1: i32, %arg2: i32) -> (i32, i32) {
    %c0_i32 = arith.constant 0 : i32
    %c0_i32_0 = arith.constant 0 : i32
    %c0_i32_1 = arith.constant 0 : i32
    return %c0_i32, %c0_i32_0 : i32, i32
  }
  func.func @transform_2(%arg0: i32, %arg1: i32, %arg2: i32) -> (i32, i32, i32, i32) {
    %c0_i32 = arith.constant 0 : i32
    %c0_i32_0 = arith.constant 0 : i32
    return %arg0, %arg1, %arg2, %c0_i32 : i32, i32, i32, i32
  }
  func.func @transform_3(%arg0: i32, %arg1: i32, %arg2: i32) -> (i32, i32, i32, i32) {
    %c0_i32 = arith.constant 0 : i32
    %c0_i32_0 = arith.constant 0 : i32
    %c0_i32_1 = arith.constant 0 : i32
    return %arg0, %arg1, %c0_i32, %c0_i32_0 : i32, i32, i32, i32
  }
}

</mosaic_0001>

<bundles_post_ra>
// kernel: downsample_block.1
= control target key start
LH: loop header
LB: loop body
LE: loop exit
PB: predicated region body
PF: predicated region fallthrough
CT: control target
= control target key end

     0   :  { %s1144_s12 = smov 0   ;;  %s1146_s13 = smov 0   ;;  %s1260_s0 = inlined_call_operand.vmem [shape: bf16[9,4,4], index: 0, kind: input, shape index: {}]   ;;  %s1261_s1 = inlined_call_operand.vmem [shape: f32[4,1], index: 1, kind: input, shape index: {}]   ;;  %s1262_s2 = inlined_call_operand.vmem [shape: bf16[2,1,4,324], index: 2, kind: input, shape index: {}]   ;;  %s1263_s3 = inlined_call_operand.vmem [shape: f32[2,1,4,72], index: 3, kind: output, shape index: {}]  }
   0x1   :  { %s1148_s14 = smov 0  }
   0x2 LB: > { %s32_s15 = sadd.s32 1, %s1107_s13  ;;  %p919_p0 = scmp.ge.s32.totalorder %s1111_s14, 1  ;;  %s1111_s14 = sphi %s1148_s14, %s13_s14   ;;  %s1107_s13 = sphi %s1146_s13, %s1265_s13   ;;  %s1103_s12 = sphi %s1144_s12, %s1264_s12  }
   0x3   : > { %p34_p1 = scmp.ge.s32.totalorder %s32_s15, 2  ;;  %p179_p2 = scmp.lt.s32.totalorder %s1111_s14, 3 }
   0x5   : > { %s1267_s15 = smov (%p34_p1, %s32_s15), 0  ;;  %p180_p3 = pnand %p919_p0, %p179_p2 }
   0x6   : > { %p221_p4 = scmp.lt.s32.totalorder (!%p180_p3), %s1103_s12, 1  ;;  %v1113_v0 = vmov (!%p180_p3), 0.0   ;;  %vm1114_vm0 = vmmov (!%p180_p3), 0   ;;  %vm255_vm1 = vcmask (!%p180_p3), 1041408   ;;  %s1115_s20 = smov (!%p180_p3), 13   ;;  %vm251_vm2 = vcmask (!%p180_p3), 31744  }
   0x7   : > { %183 = sbr.rel (%p180_p3) target bundleno = 416 (0x1a0), region = 32  ;;  %967 = vmatprep.subr.bf16.mxu1 (!%p180_p3), %v1113_v0  ;;  %969 = vmatprep.mubr.msk.bf16.mxu1 (!%p180_p3), %vm1114_vm0, %v1113_v0  ;;  %s1116_s21 = smov (!%p180_p3), 93   ;;  %v250_v7 = vld [vmem:[%s1260_s0] sm:$0x3] (!%p180_p3)  ;;  %vm246_vm3 = vcmask (!%p180_p3), 584704   ;;  %v1123_v11 = vmov (!%p180_p3), 0  }
   0x8   : > { %991 = vmatprep.subr.bf16.mxu0 (!%p180_p3), %v1113_v0  ;;  %993 = vmatprep.mubr.msk.bf16.mxu0 (!%p180_p3), %vm1114_vm0, %v1113_v0  ;;  %s1117_s24 = smov (!%p180_p3), 47   ;;  %s1118_s25 = smov (!%p180_p3), 119   ;;  %v801_v10 = vld [vmem:[%s1261_s1] sm:$0xf] (!%p180_p3)  ;;  %247 = vst.msk [vmem:[#allocation2] sm:$0xf] (!%p180_p3), %vm246_vm3, %v1113_v0 }
   0x9   : > { %s1119_s26 = smov (!%p180_p3), 127   ;;  %s1120_s27 = smov (!%p180_p3), 38   ;;  %1087 = vset.pattern.permute.xlu1 (!%p180_p3), %v1123_v11  ;;  %1088 = vset.pattern.permute.xlu0 (!%p180_p3), %v1123_v11  ;;  %vm501_vm4 = vcmask (!%p180_p3), 105472   ;;  %vm316_vm5 = vcmask (!%p180_p3), 384000   ;;  %v932_v18 = vld [vmem:[%s1260_s0 + $0x8] sm:$0x3] (!%p180_p3) }
   0xa   : > { %s1121_s28 = smov (!%p180_p3), 94   ;;  %s1122_s29 = smov (!%p180_p3), 118   ;;  %v923_v24 = vld [vmem:[%s1260_s0 + $0x2] sm:$0x3] (!%p180_p3)  ;;  %v935_v28 = vld [vmem:[%s1260_s0 + $0xa] sm:$0x3] (!%p180_p3) }
   0xb   : > { %v926_v31 = vld [vmem:[%s1260_s0 + $0x4] sm:$0x3] (!%p180_p3)  ;;  %vm686_vm6 = vcmask (!%p180_p3), 310272   ;;  %v938_v35 = vld [vmem:[%s1260_s0 + $0xc] sm:$0x3] (!%p180_p3) }
   0xc   : > { %v929_v37 = vld [vmem:[%s1260_s0 + $0x6] sm:$0x3] (!%p180_p3)  ;;  %v941_v39 = vld [vmem:[%s1260_s0 + $0xe] sm:$0x3] (!%p180_p3)  ;;  %v944_v41 = vld [vmem:[%s1260_s0 + $0x10] sm:$0x3] (!%p180_p3) }
   0xe   : > { %s1269_s12 = smov (!%p221_p4, %s1103_s12), 1 }
   0xf   : > { %s1051_s16 = smul.u32 6, %s1269_s12  ;;  %v248_v46 = vld [vmem:[#allocation2] sm:$0xf] }
  0x11   : > { %s233_s19 = scalar_lea.vmem %s1262_s2, %s1051_s16 }
  0x12   : > { %v933_v1 = vld.sshfl [vmem:[%s233_s19 + $0x2] sm:$0x33 pattern:$0x76325410]  ;;  %v249_v2 = vld [vmem:[%s233_s19] sm:$0x3] }
  0x13   : > { %497 = vrot.lane.b32.xlu0 %v933_v1, %s1115_s20  ;;  %v496_v3 = vcombine.high %v933_v1, %v933_v1  ;;  %v936_v4 = vld.sshfl [vmem:[%s233_s19 + $0x2] sm:$0x3 pattern:$0x76325410]  ;;  %v257_v5 = vsel %vm255_vm1, %v249_v2, 0 }
  0x14   : > { %561 = vrot.lane.b32.xlu1 %v936_v4, %s1116_s21  ;;  %v924_v6 = vld.sshfl [vmem:[%s233_s19] sm:$0x33 pattern:$0x76325410]  ;;  %968 = vmatpush3.bf16.msra.mxu1 %v257_v5 }
  0x15   : > { %973 = vmatprep.subr.bf16.mxu1 %v1113_v0  ;;  %v311_v8 = vcombine.high %v924_v6, %v924_v6  ;;  %v939_v9 = vld.sshfl [vmem:[%s233_s19] sm:$0x3 pattern:$0x76325410] }
  0x17   : > { %499 = vrot.lane.b32.xlu0 %v496_v3, %s1115_s20  ;;  %970 = vmatmul.mubr.msk.bf16.vlgmr.msra.gmra.mrb[0].mxu1 %vm251_vm2, %v250_v7 }
  0x18   : > { %312 = vrot.lane.b32.xlu1 %v924_v6, %s1117_s24  ;;  %975 = vmatprep.mubr.msk.bf16.mxu1 %vm1114_vm0, %v1113_v0 }
  0x1b   : > { %314 = vrot.lane.b32.xlu0 %v311_v8, %s1117_s24 }
  0x1c   : > { %621 = vrot.lane.b32.xlu1 %v939_v9, %s1118_s25  ;;  %s921_s25 = sshll.u32 %s1269_s12, 2 }
  0x1f   : > { %376 = vrot.lane.b32.xlu0 %v939_v9, %s1119_s26 }
  0x20   : > { %682 = vrot.lane.b32.xlu1 %v924_v6, %s1120_s27 }
  0x23   : > { %684 = vrot.lane.b32.xlu0 %v311_v8, %s1120_s27 }
  0x24   : > { %436 = vrot.lane.b32.xlu1 %v936_v4, %s1121_s28  ;;  %s240_s28 = scalar_lea.vmem %s1263_s3, %s921_s25 }
  0x27   : > { %746 = vrot.lane.b32.xlu0 %v939_v9, %s1122_s29 }
  0x28   : > { %804 = vperm.xlu1 %1087, %v801_v10  }
  0x85   : > { %v498_v12 = vpop.permute.xlu0 %497 }
  0x86   : > { %v562_v13 = vpop.permute.xlu1 %561 }
  0x87   : > { %v567_v19 = vsel %vm255_vm1, %v562_v13, 0 }
  0x89   : > { %v500_v14 = vpop.permute.xlu0 %499 }
  0x8a   : > { %v502_v15 = vsel %vm501_vm4, %v498_v12, %v500_v14  ;;  %v313_v16 = vpop.permute.xlu1 %312 }
  0x8b   : > { %v507_v17 = vsel %vm255_vm1, %v502_v15, 0 }
  0x8c   : > { %992 = vmatpush3.bf16.msra.mxu0 %v507_v17 }
  0x8d   : > { %v315_v20 = vpop.permute.xlu0 %314  ;;  %997 = vmatprep.subr.bf16.mxu0 %v1113_v0 }
  0x8e   : > { %v317_v21 = vsel %vm316_vm5, %v313_v16, %v315_v20  ;;  %v622_v22 = vpop.permute.xlu1 %621 }
  0x8f   : > { %v322_v23 = vsel %vm255_vm1, %v317_v21, 0  ;;  %994 = vmatmul.mubr.msk.bf16.vlgmr.msra.gmra.mrb[0].mxu0 %vm251_vm2, %v932_v18  ;;  %v627_v29 = vsel %vm255_vm1, %v622_v22, 0 }
  0x90   : > { %974 = vmatpush3.bf16.msra.mxu1 %v322_v23  ;;  %998 = vmatpush3.bf16.msra.mxu0 %v567_v19 }
  0x91   : > { %999 = vmatprep.mubr.msk.bf16.mxu0 %vm1114_vm0, %v1113_v0  ;;  %v377_v25 = vpop.permute.xlu0 %376  ;;  %979 = vmatprep.subr.bf16.mxu1 %v1113_v0 }
  0x92   : > { %v382_v26 = vsel %vm255_vm1, %v377_v25, 0  ;;  %1003 = vmatprep.subr.bf16.mxu0 %v1113_v0  ;;  %v683_v27 = vpop.permute.xlu1 %682 }
  0x93   : > { %976 = vmatmul.mubr.msk.bf16.vlgmr.msra.gmra.mrb[0].mxu1 %vm251_vm2, %v923_v24 }
  0x94   : > { %980 = vmatpush3.bf16.msra.mxu1 %v382_v26  ;;  %981 = vmatprep.mubr.msk.bf16.mxu1 %vm1114_vm0, %v1113_v0 }
  0x95   : > { %985 = vmatprep.subr.bf16.mxu1 %v1113_v0  ;;  %v685_v33 = vpop.permute.xlu0 %684 }
  0x96   : > { %v437_v30 = vpop.permute.xlu1 %436  ;;  %v687_v34 = vsel %vm686_vm6, %v683_v27, %v685_v33 }
  0x97   : > { %v442_v32 = vsel %vm255_vm1, %v437_v30, 0  ;;  %v692_v36 = vsel %vm255_vm1, %v687_v34, 0 }
  0x99   : > { %v747_v38 = vpop.permute.xlu0 %746 }
  0x9a   : > { %v752_v40 = vsel %vm255_vm1, %v747_v38, 0 }
  0x9b   : > { %1000 = vmatmul.mubr.msk.bf16.vlgmr.msra.gmra.mrb[0].mxu0 %vm251_vm2, %v935_v28 }
  0x9c   : > { %1004 = vmatpush3.bf16.msra.mxu0 %v627_v29  ;;  %1005 = vmatprep.mubr.msk.bf16.mxu0 %vm1114_vm0, %v1113_v0 }
  0x9d   : > { %1009 = vmatprep.subr.bf16.mxu0 %v1113_v0 }
  0x9f   : > { %982 = vmatmul.mubr.msk.bf16.vlgmr.msra.gmra.mrb[0].mxu1 %vm251_vm2, %v926_v31 }
  0xa0   : > { %986 = vmatpush3.bf16.msra.mxu1 %v442_v32  ;;  %987 = vmatprep.mubr.msk.bf16.mxu1 %vm1114_vm0, %v1113_v0 }
  0xa7   : > { %1006 = vmatmul.mubr.msk.bf16.vlgmr.msra.gmra.mrb[0].mxu0 %vm251_vm2, %v938_v35  ;;  %v805_v53 = vpop.permute.xlu1 %804 }
  0xa8   : > { %1010 = vmatpush3.bf16.msra.mxu0 %v692_v36  ;;  %1011 = vmatprep.mubr.msk.bf16.mxu0 %vm1114_vm0, %v1113_v0 }
  0xa9   : > { %1015 = vmatprep.subr.bf16.mxu0 %v1113_v0 }
  0xab   : > { %988 = vmatmul.mubr.msk.bf16.vlgmr.msra.gmra.mrb[0].mxu1 %vm251_vm2, %v929_v37 }
  0xb3   : > { %1012 = vmatmul.mubr.msk.bf16.vlgmr.msra.gmra.mrb[0].mxu0 %vm251_vm2, %v941_v39 }
  0xb4   : > { %1016 = vmatpush3.bf16.msra.mxu0 %v752_v40  ;;  %1017 = vmatprep.mubr.msk.bf16.mxu0 %vm1114_vm0, %v1113_v0 }
  0xbf   : > { %1018 = vmatmul.mubr.msk.bf16.vlgmr.msra.gmra.mrb[0].mxu0 %vm251_vm2, %v944_v41 }
 0x17e   : > { %v478_v42 = vpop.f32.mrb[0].mxu1 }
 0x17f   : > { %v989_v43 = vpop.f32.mrb[1].mxu1  ;;  %v1021_v47 = vadd.f32 %v478_v42, %v248_v46 }
 0x180   : > { %v481_v44 = vpop.f32.mrb[2].mxu1 }
 0x181   : > { %v990_v45 = vpop.f32.mrb[3].mxu1 }
 0x192   : > { %v788_v48 = vpop.f32.mrb[0].mxu0 }
 0x193   : > { %v1022_v49 = vadd.f32 %v1021_v47, %v788_v48  ;;  %v1019_v50 = vpop.f32.mrb[1].mxu0 }
 0x194   : > { %v791_v51 = vpop.f32.mrb[2].mxu0 }
 0x195   : > { %796 = vst.msk [vmem:[#allocation2] sm:$0xf] %vm246_vm3, %v1022_v49  ;;  %v1020_v52 = vpop.f32.mrb[3].mxu0 }
 0x19c   : > { %v800_v54 = vld [vmem:[#allocation2] sm:$0xf] }
 0x19d   : > { %v807_v55 = vadd.f32 %v805_v53, %v800_v54 }
 0x19f   : > { %808 = vst.msk [vmem:[%s240_s28] sm:$0xf] %vm246_vm3, %v807_v55 }
 0x1a0 PF: > { %s13_s14 = sadd.s32 1, %s1111_s14   ;;  %s1264_s12 = smov %s1107_s13 }
 0x1a1   : > { %p10_p5 = scmp.ge.s32.totalorder %s13_s14, 4   ;;  %s1265_s13 = smov %s1267_s15 }
 0x1a3   :  { %12 = sbr.rel (!%p10_p5) target bundleno = 2 (0x2), region = 81 }

</bundles_post_ra>
